<compile_context>
chip_gen: v6e
topology: v6e:2x2x1
jax: 0.10.0
libtpu: 0.0.40
codegen_flags: <defaults>
</compile_context>

<pallas_src>
import functools

import jax
import jax.numpy as jnp
import numpy as np
from jax.experimental import pallas as pl
from jax.experimental.pallas import tpu as pltpu


def _vmem_capacity_bytes():
    """Physical VMEM of the current TPU generation (conservative fallback)."""
    try:
        info = pltpu.get_tpu_info()
        cap = getattr(info, "vmem_capacity_bytes", None)
        if cap:
            return int(cap)
    except Exception:
        pass
    return 64 << 20  # assume the smallest (v7x per-TensorCore VMEM)


def _static_int_p(p):
    """Return int(p) if p is a concrete (non-traced) small positive integer."""
    try:
        pf = float(np.asarray(p).reshape(()))
    except Exception:
        return None  # traced value (e.g. under jit) -> general exp/log path
    if pf.is_integer() and 1.0 <= pf <= 8.0:
        return int(pf)
    return None


def _row_tile(rows, hw_t, max_elems):
    """Largest legal row tile for a (rt, hw_t) block within max_elems elems.

    Legality (lane-dense (1, rt) output block + (8, 128) input tiling):
      rt must be a multiple of 128, or rt == rows.
    Row-axis overhang on the last block is allowed (rows independent; OOB
    output rows are discarded by Pallas).
    """
    cap = max_elems // max(hw_t, 1)
    if cap <= 0:
        return None
    if rows <= 128:
        return rows if rows <= cap else None
    rt = (min(rows, cap, 2048) // 128) * 128
    if rt == 0:
        return None
    # Keep >= 2 steps on the parallel (row) axis so both v7x TensorCores get
    # work; no-op on 1-TC chips (v5e / v6e).
    if rt >= rows:
        rt = max(128, (((rows + 1) // 2 + 127) // 128) * 128)
    return rt


def _choose_tiles(rows, hw, itemsize, block_budget_bytes):
    """Pick (rt, hw_t) for the (rows, hw) input within the VMEM block budget."""
    max_elems = max(block_budget_bytes // itemsize, 8 * 128)

    # Preferred: full-hw block -> one fat contiguous DMA per row.
    rt = _row_tile(rows, hw, max_elems)
    if rt is not None:
        return rt, hw

    # Full hw does not fit: tile the spatial axis with the largest
    # 128-multiple divisor of hw that still admits a legal row tile.
    min_rt = min(rows, 128)
    best_hw_t = None
    t = 128
    while t <= hw // 2:
        if hw % t == 0 and t * min_rt <= max_elems:
            best_hw_t = t
        t += 128
    if best_hw_t is not None:
        rt = _row_tile(rows, best_hw_t, max_elems)
        if rt is not None:
            return rt, best_hw_t

    # Pathological hw (no 128-multiple divisor fits): keep full hw with the
    # smallest legal row tile and let the VMEM limit scale with the block.
    # TODO(synk): mask a non-dividing hw tile for such shapes instead.
    return min_rt, hw


def gem_kernel(p_ref, x_ref, o_ref, acc_ref, *, eps, inv_hw, int_p):
    """GeM over one (row-tile, hw-tile) block.

    p_ref:   (1,)        SMEM float32  -- learnable GeM exponent
    x_ref:   (rt, hw_t)  VMEM          -- input tile (rows = flattened B*C)
    o_ref:   (1, rt)     VMEM float32  -- pooled output, lane-dense in rows
    acc_ref: (rt, 1)     VMEM float32  -- running sum of x**p over the window
    """
    hw_i = pl.program_id(1)

    @pl.when(hw_i == 0)
    def _():
        acc_ref[...] = jnp.zeros_like(acc_ref)

    # clamp(min=eps) -> strictly positive, so pow via exp/log is exact-domain.
    x = jnp.maximum(x_ref[...].astype(jnp.float32), eps)        # (rt, hw_t)

    if int_p is not None:
        # Static integer p (default GeM init p=3): repeated VPU multiplies,
        # no EUP transcendentals on the streamed elements.
        xp = x
        for _ in range(int_p - 1):
            xp = xp * x
    else:
        # General (traced / non-integer) p: x ** p via EUP exp/log.
        p = p_ref[0]
        xp = jnp.exp(p * jnp.log(x))

    acc_ref[...] += jnp.sum(xp, axis=-1, keepdims=True)          # (rt, 1)

    @pl.when(hw_i == pl.num_programs(1) - 1)
    def _():
        p = p_ref[0]
        m = acc_ref[...] * inv_hw                                # mean over H*W
        y = jnp.exp(jnp.log(m) / p)                              # m ** (1/p)
        o_ref[...] = jnp.transpose(y).astype(o_ref.dtype)        # (1, rt)


def gem_pallas(x_nchw, p, eps=1e-6):
    """GeM forward. Input NCHW (f32 or bf16), output (B, C, 1, 1) float32."""
    B, C, H, W = x_nchw.shape
    rows, hw = B * C, H * W

    # Free reshape (contiguous dims), NOT a transpose -> no extra HBM pass.
    x2 = x_nchw.reshape(rows, hw)
    p_arr = jnp.asarray(p, dtype=jnp.float32).reshape((1,))
    int_p = _static_int_p(p)

    vmem_cap = _vmem_capacity_bytes()
    # ~1/8 of physical VMEM per input block (2 double-buffered blocks = 1/4),
    # i.e. 8 MiB on v7x and 16 MiB on v5e/v6e.
    block_budget = max(min(vmem_cap // 8, 16 << 20), 2 << 20)
    itemsize = jnp.dtype(x2.dtype).itemsize
    rt, hw_t = _choose_tiles(rows, hw, itemsize, block_budget)

    block_bytes = rt * hw_t * itemsize
    vmem_limit = int(min(max(5 * block_bytes // 2 + (4 << 20), 16 << 20),
                         (vmem_cap * 3) // 4))

    kernel = functools.partial(
        gem_kernel, eps=float(eps), inv_hw=1.0 / float(hw), int_p=int_p)

    out = pl.pallas_call(
        kernel,
        out_shape=jax.ShapeDtypeStruct((1, rows), jnp.float32),
        grid=(pl.cdiv(rows, rt), pl.cdiv(hw, hw_t)),
        in_specs=[
            pl.BlockSpec(memory_space=pltpu.MemorySpace.SMEM),   # p (scalar)
            pl.BlockSpec((rt, hw_t), lambda r, h: (r, h)),       # x tile
        ],
        out_specs=pl.BlockSpec((1, rt), lambda r, h: (0, r)),
        scratch_shapes=[pltpu.VMEM((rt, 1), jnp.float32)],
        compiler_params=pltpu.CompilerParams(
            dimension_semantics=("parallel", "arbitrary"),
            vmem_limit_bytes=vmem_limit,
        ),
    )(p_arr, x2)

    return out.reshape(B, C, 1, 1)


def gem_reference(x_nchw, p, eps=1e-6):
    """Pure-JAX reference mirroring the PyTorch GeM semantics."""
    p = jnp.asarray(p, dtype=jnp.float32).reshape((1, 1, 1, 1))
    xc = jnp.maximum(x_nchw.astype(jnp.float32), eps)
    m = jnp.mean(xc ** p, axis=(2, 3), keepdims=True)
    return m ** (1.0 / p)


if __name__ == "__main__":
    # GeM has one learnable scalar p (init 3.0 in the module) and a fixed eps.
    B, C, H, W = 2, 4, 16, 16
    eps = 1e-6

    key = jax.random.PRNGKey(0)
    x = jax.random.normal(key, (B, C, H, W), dtype=jnp.float32)

    # Default module init p=3: static-integer fast path (VPU multiplies).
    out3 = jax.block_until_ready(gem_pallas(x, 3.0, eps=eps))
    ref3 = jax.block_until_ready(gem_reference(x, 3.0, eps=eps))
    assert out3.shape == (B, C, 1, 1), out3.shape
    np.testing.assert_allclose(np.asarray(out3), np.asarray(ref3),
                               rtol=1e-4, atol=1e-6)

    # Non-integer (learned) p: general exp/log path.
    p_learned = jnp.asarray([2.5], dtype=jnp.float32)
    outg = jax.block_until_ready(gem_pallas(x, p_learned, eps=eps))
    refg = jax.block_until_ready(gem_reference(x, p_learned, eps=eps))
    np.testing.assert_allclose(np.asarray(outg), np.asarray(refg),
                               rtol=1e-4, atol=1e-6)

    print("KERNEL_OK")
</pallas_src>

<mosaic_0001>
module attributes {stable_mosaic.version = 11 : i64} {
  func.func @gem_kernel(%arg0: i32, %arg1: i32, %arg2: memref<1xf32, #tpu.memory_space<smem>>, %arg3: memref<8x256xf32, #tpu.memory_space<vmem>>, %arg4: memref<1x8xf32, #tpu.memory_space<vmem>>, %arg5: memref<8x1xf32, #tpu.memory_space<vmem>>) attributes {dimension_semantics = [#tpu.dimension_semantics<parallel>, #tpu.dimension_semantics<arbitrary>], iteration_bounds = array<i64: 1, 1>, scalar_prefetch = 0 : i64, scratch_operands = 1 : i64, tpu.core_type = #tpu.core_type<tc>, window_params = [{transform_indices = @transform_0, window_bounds = array<i64: 1>}, {transform_indices = @transform_1, window_bounds = array<i64: 8, 256>}, {transform_indices = @transform_2, window_bounds = array<i64: 1, 8>}]} {
    %c0_i32 = arith.constant 0 : i32
    %0 = arith.cmpi eq, %arg1, %c0_i32 : i32
    %1 = arith.extui %0 : i1 to i32
    %c0_i32_0 = arith.constant 0 : i32
    %2 = arith.cmpi ne, %1, %c0_i32_0 : i32
    scf.if %2 {
      %cst_9 = arith.constant 0.000000e+00 : f32
      %16 = vector.broadcast %cst_9 : f32 to vector<8x1xf32>
      %c0_10 = arith.constant 0 : index
      %c0_11 = arith.constant 0 : index
      %17 = vector.load %arg5[%c0_10, %c0_11] : memref<8x1xf32, #tpu.memory_space<vmem>>, vector<8x1xf32>
      tpu.vector_store %arg5[%c0_10, %c0_11], %16 {strides = array<i32>} : memref<8x1xf32, #tpu.memory_space<vmem>>, vector<8x1xf32>,
    } else {
    }
    %c0 = arith.constant 0 : index
    %c0_1 = arith.constant 0 : index
    %3 = vector.load %arg3[%c0, %c0_1] : memref<8x256xf32, #tpu.memory_space<vmem>>, vector<8x256xf32>
    %cst = arith.constant 9.99999997E-7 : f32
    %4 = vector.broadcast %cst : f32 to vector<8x256xf32>
    %5 = arith.maximumf %3, %4 : vector<8x256xf32>
    %6 = arith.mulf %5, %5 : vector<8x256xf32>
    %7 = arith.mulf %6, %5 : vector<8x256xf32>
    %c0_2 = arith.constant 0 : index
    %c0_3 = arith.constant 0 : index
    %8 = vector.load %arg5[%c0_2, %c0_3] : memref<8x1xf32, #tpu.memory_space<vmem>>, vector<8x1xf32>
    %cst_4 = arith.constant dense<0.000000e+00> : vector<8xf32>
    %9 = vector.multi_reduction <add>, %7, %cst_4 [1] : vector<8x256xf32> to vector<8xf32>
    %10 = vector.shape_cast %9 : vector<8xf32> to vector<8x1xf32>
    %11 = arith.addf %8, %10 : vector<8x1xf32>
    %c0_5 = arith.constant 0 : index
    %c0_6 = arith.constant 0 : index
    %12 = vector.load %arg5[%c0_5, %c0_6] : memref<8x1xf32, #tpu.memory_space<vmem>>, vector<8x1xf32>
    tpu.vector_store %arg5[%c0_5, %c0_6], %11 {strides = array<i32>} : memref<8x1xf32, #tpu.memory_space<vmem>>, vector<8x1xf32>,
    %c0_i32_7 = arith.constant 0 : i32
    %13 = arith.cmpi eq, %arg1, %c0_i32_7 : i32
    %14 = arith.extui %13 : i1 to i32
    %c0_i32_8 = arith.constant 0 : i32
    %15 = arith.cmpi ne, %14, %c0_i32_8 : i32
    scf.if %15 {
      %c0_9 = arith.constant 0 : index
      %16 = memref.load %arg2[%c0_9] : memref<1xf32, #tpu.memory_space<smem>>
      %c0_10 = arith.constant 0 : index
      %c0_11 = arith.constant 0 : index
      %17 = vector.load %arg5[%c0_10, %c0_11] : memref<8x1xf32, #tpu.memory_space<vmem>>, vector<8x1xf32>
      %cst_12 = arith.constant 3.906250e-03 : f32
      %18 = vector.broadcast %cst_12 : f32 to vector<8x1xf32>
      %19 = arith.mulf %17, %18 : vector<8x1xf32>
      %20 = math.log %19 : vector<8x1xf32>
      %21 = vector.broadcast %16 : f32 to vector<8x1xf32>
      %22 = arith.divf %20, %21 : vector<8x1xf32>
      %23 = math.exp %22 : vector<8x1xf32>
      %24 = tpu.transpose %23, [1, 0] : vector<8x1xf32> -> vector<1x8xf32>
      %c0_13 = arith.constant 0 : index
      %c0_14 = arith.constant 0 : index
      %25 = vector.load %arg4[%c0_13, %c0_14] : memref<1x8xf32, #tpu.memory_space<vmem>>, vector<1x8xf32>
      tpu.vector_store %arg4[%c0_13, %c0_14], %24 {strides = array<i32>} : memref<1x8xf32, #tpu.memory_space<vmem>>, vector<1x8xf32>,
    } else {
    }
    return
  }
  func.func @transform_0(%arg0: i32, %arg1: i32) -> i32 {
    %c0_i32 = arith.constant 0 : i32
    %c0_i32_0 = arith.constant 0 : i32
    return %c0_i32 : i32
  }
  func.func @transform_1(%arg0: i32, %arg1: i32) -> (i32, i32) {
    %c0_i32 = arith.constant 0 : i32
    return %arg0, %arg1 : i32, i32
  }
  func.func @transform_2(%arg0: i32, %arg1: i32) -> (i32, i32) {
    %c0_i32 = arith.constant 0 : i32
    %c0_i32_0 = arith.constant 0 : i32
    return %c0_i32, %arg0 : i32, i32
  }
}

</mosaic_0001>

<bundles_post_ra>
// kernel: tpu_custom_call.1
= control target key start
LH: loop header
LB: loop body
LE: loop exit
PB: predicated region body
PF: predicated region fallthrough
CT: control target
= control target key end

     0   :  { %8 = vsyncpa [#allocation5], 0  ;;  %s190_s0 = inlined_call_operand.<no memory space> [shape: f32[1], index: 0, kind: input, shape index: {}]   ;;  %s191_s1 = inlined_call_operand.hbm [shape: f32[8,256], index: 1, kind: input, shape index: {}]   ;;  %s192_s2 = inlined_call_operand.hbm [shape: f32[1,8], index: 2, kind: output, shape index: {}]  }
   0x1   :  { %9 = vsyncpa [#allocation6], 0  ;;  %s161_s9 = smov [#allocation4]  }
   0x2   :  { %s18_s10 = sshll.u32 %s161_s9, 4  ;;  %s19_s10 = int_to_ptr.vmem [resolvable:$true] %s18_s10 }
   0x3   :  { %s125_s11 = scalar_lea.vmem %s19_s10, 256  ;;  %p130_p1 = scmp.lt.s32.totalorder %s19_s10, %s19_s10 }
   0x4   :  { %p126_p0 = scmp.ne.s32.totalorder %s19_s10, %s125_s11  ;;  %p131_p2 = scmp.lt.s32.totalorder %s125_s11, %s125_s11 }
   0x6   :  { %p132_p3 = por %p131_p2, %p130_p1 }
   0x8   :  { %p133_p4 = pnand %p132_p3, %p126_p0 }
   0xa   :  { %136 = shalt.err (!%p133_p4)
}
   0xb   :  { %21 = dma.hbm_to_vmem [thread:$0]  %s191_s1, 256, %s19_s10, [#allocation5]  }
   0xc   :  { %157 = dma.done.wait [#allocation5], 256  }
   0xd   :  { %158 = vsyncadd [#allocation5], 4294967040  ;;  %vm29_vm0 = vcmask 7168   ;;  %v162_v0 = vmov 0.0   ;;  %v31_v1 = vld [vmem:[#allocation4] sm:$0xff]  ;;  %v32_v2 = vld [vmem:[#allocation4 + $0x8] sm:$0xff]  ;;  %v54_v13 = vstv %s190_s0 }
   0xe   :  { %30 = vst.msk [vmem:[#allocation2] sm:$0xff] %vm29_vm0, %v162_v0  ;;  %v33_v3 = vmax.f32 %v31_v1, 1e-06  ;;  %v34_v4 = vmax.f32 %v32_v2, 1e-06  ;;  %111 = vrcp.f32 %v54_v13  ;;  %s163_s15 = smov [#allocation7]  }
   0xf   :  { %s99_s16 = sshll.u32 %s163_s15, 4  ;;  %vm91_vm1 = vcmask 57344   ;;  %s100_s16 = int_to_ptr.vmem [resolvable:$true] %s99_s16 }
  0x10   :  { %v35_v5 = vmul.f32 %v33_v3, %v33_v3  ;;  %v36_v6 = vmul.f32 %v34_v4, %v34_v4  ;;  %s137_s17 = scalar_lea.vmem %s100_s16, 16  ;;  %s141_s0 = scalar_lea.vmem %s100_s16, 32 }
  0x11   :  { %p138_p5 = scmp.ne.s32.totalorder %s100_s16, %s137_s17  ;;  %p142_p6 = scmp.lt.s32.totalorder %s100_s16, %s100_s16 }
  0x12   :  { %v37_v7 = vmul.f32 %v35_v5, %v33_v3  ;;  %v38_v8 = vmul.f32 %v36_v6, %v34_v4  ;;  %p143_p7 = scmp.lt.s32.totalorder %s141_s0, %s137_s17 }
  0x14   :  { %v40_v9 = vadd.f32 %v38_v8, %v37_v7  ;;  %p144_p8 = por %p143_p7, %p142_p6 }
  0x15   :  { %v39_v10 = vld [vmem:[#allocation2] sm:$0xff] }
  0x16   :  { %41 = vadd.xlane.f32.xlu0 %v40_v9  ;;  %p145_p9 = pnand %p144_p8, %p138_p5 }
  0x1b   :  { %v112_v16 = vpop.eup %111 }
  0x9f   :  { %v42_v11 = vpop.xlane.xlu0 %41 }
  0xa0   :  { %v43_v12 = vadd.f32 %v42_v11, %v39_v10 }
  0xa2   :  { %45 = vst.msk [vmem:[#allocation2] sm:$0xff] %vm29_vm0, %v43_v12 }
  0xa9   :  { %v50_v14 = vld [vmem:[#allocation2] sm:$0xff] }
  0xaa   :  { %v51_v15 = vmul.f32 0.00390625, %v50_v14 }
  0xac   :  { %113 = vlog2.f32 %v51_v15 }
  0xb9   :  { %v114_v17 = vpop.eup %113 }
  0xba   :  { %v53_v18 = vmul.f32 0.6931472, %v114_v17 }
  0xbc   :  { %v56_v19 = vmul.f32 %v112_v16, %v53_v18 }
  0xbe   :  { %v57_v20 = vmul.f32 1.442695, %v56_v19 }
  0xc0   :  { %115 = vpow2.f32 %v57_v20 }
  0xcd   :  { %v116_v21 = vpop.eup %115 }
  0xce   :  { %59 = vxpose.xlu0.b32.start.end [1/1] (short) (narrow) %v116_v21, 8 }
 0x14a   :  { %v75_v22 = vpop.trf.xlu0 }
 0x14b   :  { %92 = vst.msk [vmem:[#allocation7] sm:$0x1] %vm91_vm1, %v75_v22 }
 0x14c   :  { %148 = shalt.err (!%p145_p9)
}
 0x14d   :  { %102 = dma.vmem_to_hbm [thread:$0]  %s100_s16, 16, %s192_s2, [#allocation6]  }
 0x14e   :  { %159 = dma.done.wait [#allocation6], 16  }
 0x14f   :  { %160 = vsyncadd [#allocation6], 4294967280 }
 0x150   :  { %106 = vsyncpa [#allocation5], 1 }
 0x151   :  { %107 = vsyncpa [#allocation6], 1 }

</bundles_post_ra>
